<compile_context>
chip_gen: v7x
topology: tpu7x:2x2x1
jax: 0.10.0
libtpu: 0.0.40
codegen_flags: <defaults>
</compile_context>

<pallas_src>
import jax
import jax.numpy as jnp
from jax.experimental import pallas as pl
from jax.experimental.pallas import tpu as pltpu

IMG_MEAN = [0.485, 0.456, 0.406]
IMG_STD = [0.229, 0.224, 0.225]


# ----------------------------- Pallas kernel ------------------------------- #

def _fused_norm_linear_kernel(a_ref, mean_ref, inv_std_ref, w_ref, b_ref,
                              o_ref, acc_ref):
    """One (tm, tn) output tile, accumulated over the F (reduction) grid axis.

    a_ref:       (tm, tk)  raw pixel tile (flattened NCHW features)
    mean_ref:    (1,  tk)  per-feature channel mean
    inv_std_ref: (1,  tk)  per-feature 1/std
    w_ref:       (tk, tn)  weight tile
    b_ref:       (1,  tn)  bias tile
    o_ref:       (tm, tn)  output tile
    acc_ref:     (tm, tn)  f32 VMEM accumulator scratch
    """
    k = pl.program_id(2)

    @pl.when(k == 0)
    def _():
        acc_ref[...] = jnp.zeros_like(acc_ref)

    # Fused TF.normalize: (x - mean) * (1/std), done on the VMEM tile (VPU, free vs DMA).
    a_norm = (a_ref[...] - mean_ref[...]) * inv_std_ref[...]
    acc_ref[...] += jnp.dot(a_norm, w_ref[...],
                            preferred_element_type=jnp.float32)

    @pl.when(k == pl.num_programs(2) - 1)
    def _():
        o_ref[...] = (acc_ref[...] + b_ref[...]).astype(o_ref.dtype)


# ------------------------------ JAX wrappers -------------------------------- #

def _round_up(x, m):
    return (x + m - 1) // m * m


def _pick_tk(F):
    """Largest reduction tile that divides F (keeps VMEM per buffer <= ~256 KiB f32)."""
    for tk in (512, 256, 128):
        if F % tk == 0:
            return tk, F
    tk = 256
    return tk, _round_up(F, tk)


def fused_normalize_linear(x, w, b, mean=IMG_MEAN, std=IMG_STD):
    """TF.normalize(x, mean, std) followed by a linear head, as one tiled Pallas kernel.

    x: (N, C, H, W) f32;  w: (C*H*W, K) f32;  b: (K,) f32.
    """
    N, C, H, W = x.shape
    F = C * H * W
    K = w.shape[1]
    assert w.shape[0] == F and len(mean) == C and len(std) == C

    hw = H * W
    a = x.reshape(N, F)
    # Per-feature (flattened-channel) normalization vectors, length F.
    mean_vec = jnp.repeat(jnp.asarray(mean, jnp.float32), hw).reshape(1, F)
    inv_std_vec = jnp.repeat(1.0 / jnp.asarray(std, jnp.float32), hw).reshape(1, F)

    # --- generation-aware-ish tile sizes (all well under 64 MiB VMEM on v7x) ---
    tk, F_pad = _pick_tk(F)                 # reduction tile (multiple of 128)
    tm = min(128, _round_up(N, 8))          # sublane tile for the batch dim
    N_pad = _round_up(N, tm)
    tn = 128                                # lane-dense output tile
    K_pad = _round_up(K, tn)

    # --- pad to tile multiples (padded w rows/cols are zero => contribute nothing) ---
    a_p = jnp.pad(a, ((0, N_pad - N), (0, F_pad - F)))
    w_p = jnp.pad(w, ((0, F_pad - F), (0, K_pad - K)))
    b_p = jnp.pad(b.reshape(1, K), ((0, 0), (0, K_pad - K)))
    mean_p = jnp.pad(mean_vec, ((0, 0), (0, F_pad - F)))
    inv_std_p = jnp.pad(inv_std_vec, ((0, 0), (0, F_pad - F)), constant_values=1.0)

    grid = (N_pad // tm, K_pad // tn, F_pad // tk)

    out_p = pl.pallas_call(
        _fused_norm_linear_kernel,
        out_shape=jax.ShapeDtypeStruct((N_pad, K_pad), jnp.float32),
        grid_spec=pltpu.PrefetchScalarGridSpec(
            num_scalar_prefetch=0,
            grid=grid,
            in_specs=[
                pl.BlockSpec((tm, tk), lambda i, j, k: (i, k)),   # activations
                pl.BlockSpec((1, tk), lambda i, j, k: (0, k)),    # mean
                pl.BlockSpec((1, tk), lambda i, j, k: (0, k)),    # 1/std
                pl.BlockSpec((tk, tn), lambda i, j, k: (k, j)),   # weights
                pl.BlockSpec((1, tn), lambda i, j, k: (0, j)),    # bias
            ],
            out_specs=pl.BlockSpec((tm, tn), lambda i, j, k: (i, j)),
            scratch_shapes=[pltpu.VMEM((tm, tn), jnp.float32)],
        ),
        compiler_params=pltpu.CompilerParams(
            dimension_semantics=("parallel", "parallel", "arbitrary"),
        ),
        cost_estimate=pl.CostEstimate(
            flops=2 * N_pad * F_pad * K_pad,
            transcendentals=0,
            bytes_accessed=4 * (N_pad * F_pad + F_pad * K_pad + N_pad * K_pad),
        ),
    )(a_p, mean_p, inv_std_p, w_p, b_p)

    return out_p[:N, :K]


@jax.jit
def example_normalizer_forward(x, w, b):
    # ExampleNormalizer.forward: x = TF.normalize(x, mean, std); x = self.mdl(x)
    # (normalize fused into the synthetic linear `mdl`; no intermediate HBM round-trip)
    # NOTE: on v6e/v7x the MXU path could cast a/w to bf16 (f32 accumulate) for ~2x MXU
    # throughput if accuracy allows; kept f32 here for a tight numerical check.
    return fused_normalize_linear(x, w, b, IMG_MEAN, IMG_STD)


# ---------------------------------- main ------------------------------------ #

if __name__ == "__main__":
    key = jax.random.PRNGKey(0)
    k_x, k_w, k_b = jax.random.split(key, 3)

    N, C, H, W = 2, 3, 16, 16          # ImageNet-style 3-channel images, small spatial
    num_classes = 8
    F = C * H * W                      # 768

    x = jax.random.uniform(k_x, (N, C, H, W), dtype=jnp.float32)          # pixels in [0,1]
    w = 0.02 * jax.random.normal(k_w, (F, num_classes), dtype=jnp.float32)
    b = 0.01 * jax.random.normal(k_b, (num_classes,), dtype=jnp.float32)

    out = example_normalizer_forward(x, w, b)
    jax.block_until_ready(out)

    # lightweight sanity check against pure-JAX reference
    mean_ref = jnp.asarray(IMG_MEAN, jnp.float32).reshape(1, C, 1, 1)
    std_ref = jnp.asarray(IMG_STD, jnp.float32).reshape(1, C, 1, 1)
    x_norm_ref = (x - mean_ref) / std_ref
    out_ref = x_norm_ref.reshape(N, F) @ w + b
    assert out.shape == out_ref.shape
    assert jnp.allclose(out, out_ref, atol=1e-4, rtol=1e-4)

    print("KERNEL_OK")
</pallas_src>

<mosaic_0001>
module attributes {stable_mosaic.version = 11 : i64} {
  func.func @_fused_norm_linear_kernel(%arg0: i32, %arg1: i32, %arg2: i32, %arg3: memref<8x256xf32, #tpu.memory_space<vmem>>, %arg4: memref<1x256xf32, #tpu.memory_space<vmem>>, %arg5: memref<1x256xf32, #tpu.memory_space<vmem>>, %arg6: memref<256x128xf32, #tpu.memory_space<vmem>>, %arg7: memref<1x128xf32, #tpu.memory_space<vmem>>, %arg8: memref<8x128xf32, #tpu.memory_space<vmem>>, %arg9: memref<8x128xf32, #tpu.memory_space<vmem>>) attributes {dimension_semantics = [#tpu.dimension_semantics<parallel>, #tpu.dimension_semantics<parallel>, #tpu.dimension_semantics<arbitrary>], iteration_bounds = array<i64: 1, 1, 3>, scalar_prefetch = 0 : i64, scratch_operands = 1 : i64, tpu.core_type = #tpu.core_type<tc>, window_params = [{transform_indices = @transform_0, window_bounds = array<i64: 8, 256>}, {transform_indices = @transform_1, window_bounds = array<i64: 1, 256>}, {transform_indices = @transform_2, window_bounds = array<i64: 1, 256>}, {transform_indices = @transform_3, window_bounds = array<i64: 256, 128>}, {transform_indices = @transform_4, window_bounds = array<i64: 1, 128>}, {transform_indices = @transform_5, window_bounds = array<i64: 8, 128>}]} {
    %c0_i32 = arith.constant 0 : i32
    %0 = arith.cmpi eq, %arg2, %c0_i32 : i32
    %1 = arith.extui %0 : i1 to i32
    %c0_i32_0 = arith.constant 0 : i32
    %2 = arith.cmpi ne, %1, %c0_i32_0 : i32
    scf.if %2 {
      %cst_13 = arith.constant 0.000000e+00 : f32
      %18 = vector.broadcast %cst_13 : f32 to vector<8x128xf32>
      %c0_14 = arith.constant 0 : index
      %c0_15 = arith.constant 0 : index
      %19 = vector.load %arg9[%c0_14, %c0_15] : memref<8x128xf32, #tpu.memory_space<vmem>>, vector<8x128xf32>
      tpu.vector_store %arg9[%c0_14, %c0_15], %18 {strides = array<i32>} : memref<8x128xf32, #tpu.memory_space<vmem>>, vector<8x128xf32>,
    } else {
    }
    %c0 = arith.constant 0 : index
    %c0_1 = arith.constant 0 : index
    %3 = vector.load %arg3[%c0, %c0_1] : memref<8x256xf32, #tpu.memory_space<vmem>>, vector<8x256xf32>
    %c0_2 = arith.constant 0 : index
    %c0_3 = arith.constant 0 : index
    %4 = vector.load %arg4[%c0_2, %c0_3] : memref<1x256xf32, #tpu.memory_space<vmem>>, vector<1x256xf32>
    %5 = vector.broadcast %4 : vector<1x256xf32> to vector<8x256xf32>
    %6 = arith.subf %3, %5 : vector<8x256xf32>
    %c0_4 = arith.constant 0 : index
    %c0_5 = arith.constant 0 : index
    %7 = vector.load %arg5[%c0_4, %c0_5] : memref<1x256xf32, #tpu.memory_space<vmem>>, vector<1x256xf32>
    %8 = vector.broadcast %7 : vector<1x256xf32> to vector<8x256xf32>
    %9 = arith.mulf %6, %8 : vector<8x256xf32>
    %c0_6 = arith.constant 0 : index
    %c0_7 = arith.constant 0 : index
    %10 = vector.load %arg9[%c0_6, %c0_7] : memref<8x128xf32, #tpu.memory_space<vmem>>, vector<8x128xf32>
    %c0_8 = arith.constant 0 : index
    %c0_9 = arith.constant 0 : index
    %11 = vector.load %arg6[%c0_8, %c0_9] : memref<256x128xf32, #tpu.memory_space<vmem>>, vector<256x128xf32>
    %cst = arith.constant dense<0.000000e+00> : vector<8x128xf32>
    %12 = tpu.matmul %9, %11, %cst {dimension_numbers = #tpu.dot_dimension_numbers<[1], [0], [0], [1], [0, 0, 1, 1], [], []>} : vector<8x256xf32>, vector<256x128xf32>, vector<8x128xf32> -> vector<8x128xf32>
    %13 = arith.addf %10, %12 : vector<8x128xf32>
    %c0_10 = arith.constant 0 : index
    %c0_11 = arith.constant 0 : index
    %14 = vector.load %arg9[%c0_10, %c0_11] : memref<8x128xf32, #tpu.memory_space<vmem>>, vector<8x128xf32>
    tpu.vector_store %arg9[%c0_10, %c0_11], %13 {strides = array<i32>} : memref<8x128xf32, #tpu.memory_space<vmem>>, vector<8x128xf32>,
    %c2_i32 = arith.constant 2 : i32
    %15 = arith.cmpi eq, %arg2, %c2_i32 : i32
    %16 = arith.extui %15 : i1 to i32
    %c0_i32_12 = arith.constant 0 : i32
    %17 = arith.cmpi ne, %16, %c0_i32_12 : i32
    scf.if %17 {
      %c0_13 = arith.constant 0 : index
      %c0_14 = arith.constant 0 : index
      %18 = vector.load %arg9[%c0_13, %c0_14] : memref<8x128xf32, #tpu.memory_space<vmem>>, vector<8x128xf32>
      %c0_15 = arith.constant 0 : index
      %c0_16 = arith.constant 0 : index
      %19 = vector.load %arg7[%c0_15, %c0_16] : memref<1x128xf32, #tpu.memory_space<vmem>>, vector<1x128xf32>
      %20 = vector.broadcast %19 : vector<1x128xf32> to vector<8x128xf32>
      %21 = arith.addf %18, %20 : vector<8x128xf32>
      %c0_17 = arith.constant 0 : index
      %c0_18 = arith.constant 0 : index
      %22 = vector.load %arg8[%c0_17, %c0_18] : memref<8x128xf32, #tpu.memory_space<vmem>>, vector<8x128xf32>
      tpu.vector_store %arg8[%c0_17, %c0_18], %21 {strides = array<i32>} : memref<8x128xf32, #tpu.memory_space<vmem>>, vector<8x128xf32>,
    } else {
    }
    return
  }
  func.func @transform_0(%arg0: i32, %arg1: i32, %arg2: i32) -> (i32, i32) {
    %c0_i32 = arith.constant 0 : i32
    return %arg0, %arg2 : i32, i32
  }
  func.func @transform_1(%arg0: i32, %arg1: i32, %arg2: i32) -> (i32, i32) {
    %c0_i32 = arith.constant 0 : i32
    %c0_i32_0 = arith.constant 0 : i32
    return %c0_i32, %arg2 : i32, i32
  }
  func.func @transform_2(%arg0: i32, %arg1: i32, %arg2: i32) -> (i32, i32) {
    %c0_i32 = arith.constant 0 : i32
    %c0_i32_0 = arith.constant 0 : i32
    return %c0_i32, %arg2 : i32, i32
  }
  func.func @transform_3(%arg0: i32, %arg1: i32, %arg2: i32) -> (i32, i32) {
    %c0_i32 = arith.constant 0 : i32
    return %arg2, %arg1 : i32, i32
  }
  func.func @transform_4(%arg0: i32, %arg1: i32, %arg2: i32) -> (i32, i32) {
    %c0_i32 = arith.constant 0 : i32
    %c0_i32_0 = arith.constant 0 : i32
    return %c0_i32, %arg1 : i32, i32
  }
  func.func @transform_5(%arg0: i32, %arg1: i32, %arg2: i32) -> (i32, i32) {
    %c0_i32 = arith.constant 0 : i32
    return %arg0, %arg1 : i32, i32
  }
}

</mosaic_0001>

<bundles_post_ra>
// kernel: example_normalizer_forward.1
= control target key start
LH: loop header
LB: loop body
LE: loop exit
PB: predicated region body
PF: predicated region fallthrough
CT: control target
= control target key end

     0   :  { %s792_s18 = smov 0   ;;  %s794_s19 = smov 0   ;;  %s896_s0 = inlined_call_operand.vmem [shape: f32[8,768], index: 0, kind: input, shape index: {}]   ;;  %s897_s1 = inlined_call_operand.vmem [shape: f32[1,768], index: 1, kind: input, shape index: {}]   ;;  %s898_s2 = inlined_call_operand.vmem [shape: f32[1,768], index: 2, kind: input, shape index: {}]   ;;  %s899_s3 = inlined_call_operand.vmem [shape: f32[768,128], index: 3, kind: input, shape index: {}]   ;;  %s900_s4 = inlined_call_operand.vmem [shape: f32[1,128], index: 4, kind: input, shape index: {}]   ;;  %s901_s5 = inlined_call_operand.vmem [shape: f32[8,128], index: 5, kind: output, shape index: {}]  }
   0x1   :  { %s796_s20 = smov 0  }
   0x2 LB: > { %s27_s21 = sadd.s32 1, %s755_s19  ;;  %p632_p0 = scmp.ge.s32.totalorder %s759_s20, 1  ;;  %s759_s20 = sphi %s796_s20, %s15_s20   ;;  %s755_s19 = sphi %s794_s19, %s903_s19   ;;  %s751_s18 = sphi %s792_s18, %s902_s18  }
   0x3   : > { %p28_p1 = scmp.ge.s32.totalorder %s27_s21, 3  ;;  %p259_p2 = scmp.lt.s32.totalorder %s759_s20, 4 }
   0x5   : > { %s905_s21 = smov (%p28_p1, %s27_s21), 0  ;;  %p260_p3 = pnand %p632_p0, %p259_p2 }
   0x6   : > { %s633_s22 = sshll.u32 (!%p260_p3), %s751_s18, 1  ;;  %s637_s23 = sshll.u32 (!%p260_p3), %s751_s18, 5 }
   0x7   : > { %263 = sbr.rel (%p260_p3) target bundleno = 287 (0x11f), region = 40  ;;  %p315_p4 = scmp.lt.s32.totalorder (!%p260_p3), %s633_s22, 5 }
   0x8   : > { %p333_p5 = scmp.lt.s32.totalorder (!%p260_p3), %s637_s23, 95  ;;  %p639_p6 = scmp.ne.s32.totalorder (!%p260_p3), %s751_s18, 0 }
   0xe   : > { %s907_s22 = smov (!%p315_p4, %s633_s22), 5  ;;  %s909_s23 = smov (!%p333_p5, %s637_s23), 95 }
   0xf   : > { %s634_s24 = sshll.u32 %s907_s22, 3  ;;  %s325_s27 = scalar_lea.vmem %s897_s1, %s907_s22  ;;  %v761_v0 = vmov (!%p639_p6), 0.0  }
  0x10   : > { %s824_s30 = scalar_lea.vmem %s896_s0, %s634_s24  ;;  %s330_s8 = scalar_lea.vmem %s898_s2, %s907_s22  ;;  %355 = vst [vmem:[#allocation2] sm:$0xff] (!%p639_p6), %v761_v0 }
  0x11   : > { %s638_s9 = sshll.u32 %s909_s23, 3  ;;  %354 = sbr.rel (%p639_p6) target bundleno = 24 (0x18), region = 44 }
  0x12   : > { %s833_s12 = scalar_lea.vmem %s899_s3, %s638_s9 }
  0x18 PF: > { %v403_v1 = vld [vmem:[%s833_s12 + $0x80] sm:$0xff]  ;;  %v404_v2 = vld [vmem:[%s833_s12 + $0x88] sm:$0xff]  ;;  %v360_v4 = vlaneseq  ;;  %v405_v7 = vld [vmem:[%s833_s12 + $0x90] sm:$0xff]  ;;  %p640_p7 = scmp.ne.s32.totalorder %s751_s18, 2 }
  0x19   : > { %v387_v3 = vld [vmem:[%s833_s12] sm:$0xff]  ;;  %v680_v5 = vpack.c.bf16 %v404_v2, %v403_v1  ;;  %v388_v6 = vld [vmem:[%s833_s12 + $0x8] sm:$0xff]  ;;  %v406_v8 = vld [vmem:[%s833_s12 + $0x98] sm:$0xff] }
  0x1a   : > { %v682_v9 = vpack.c.bf16 %v388_v6, %v387_v3  ;;  %v684_v10 = vpack.c.bf16 %v406_v8, %v405_v7  ;;  %v389_v11 = vld [vmem:[%s833_s12 + $0x10] sm:$0xff]  ;;  %v390_v12 = vld [vmem:[%s833_s12 + $0x18] sm:$0xff]  ;;  %v407_v13 = vld [vmem:[%s833_s12 + $0xa0] sm:$0xff]  ;;  %v361_v16 = vshrl.u32 %v360_v4, 7 }
  0x1b   : > { %681 = vmatprep.subr.bf16.mxu0 %v680_v5  ;;  %v408_v14 = vld [vmem:[%s833_s12 + $0xa8] sm:$0xff]  ;;  %v686_v15 = vpack.c.bf16 %v390_v12, %v389_v11  ;;  %v391_v18 = vld [vmem:[%s833_s12 + $0x20] sm:$0xff]  ;;  %v409_v20 = vld [vmem:[%s833_s12 + $0xb0] sm:$0xff] }
  0x1c   : > { %683 = vmatpush3.bf16.msra.mxu0 %v682_v9  ;;  %v688_v17 = vpack.c.bf16 %v408_v14, %v407_v13  ;;  %v392_v19 = vld [vmem:[%s833_s12 + $0x28] sm:$0xff]  ;;  %v410_v21 = vld [vmem:[%s833_s12 + $0xb8] sm:$0xff]  ;;  %v366_v23 = vsub.s32 1, %v361_v16  ;;  %v393_v25 = vld [vmem:[%s833_s12 + $0x30] sm:$0xff]  ;;  %v362_v48 = vsub.s32 0, %v361_v16 }
  0x1d   : > { %685 = vmatprep.subr.bf16.mxu0 %v684_v10  ;;  %v690_v22 = vpack.c.bf16 %v392_v19, %v391_v18  ;;  %v692_v24 = vpack.c.bf16 %v410_v21, %v409_v20  ;;  %v394_v26 = vld [vmem:[%s833_s12 + $0x38] sm:$0xff]  ;;  %v411_v27 = vld [vmem:[%s833_s12 + $0xc0] sm:$0xff]  ;;  %v412_v28 = vld [vmem:[%s833_s12 + $0xc8] sm:$0xff] }
  0x1e   : > { %v357_v29 = vld [vmem:[%s824_s30 + $0x8] sm:$0xff]  ;;  %v358_v30 = vld [vmem:[%s325_s27] sm:$0x3]  ;;  %v694_v32 = vpack.c.bf16 %v394_v26, %v393_v25  ;;  %v696_v35 = vpack.c.bf16 %v412_v28, %v411_v27  ;;  %v413_v38 = vld [vmem:[%s833_s12 + $0xd0] sm:$0xff] }
  0x1f   : > { %v372_v31 = vld [vmem:[%s330_s8] sm:$0x3]  ;;  %v367_v33 = vrot.slane %v358_v30, %v366_v23  ;;  %v396_v37 = vld [vmem:[%s833_s12 + $0x48] sm:$0xff]  ;;  %v414_v39 = vld [vmem:[%s833_s12 + $0xd8] sm:$0xff]  ;;  %v363_v55 = vrot.slane %v358_v30, %v362_v48 }
  0x20   : > { %687 = vmatpush3.bf16.msra.mxu0 %v686_v15  ;;  %v381_v34 = vrot.slane %v372_v31, %v366_v23  ;;  %v395_v36 = vld [vmem:[%s833_s12 + $0x40] sm:$0xff]  ;;  %v700_v43 = vpack.c.bf16 %v414_v39, %v413_v38  ;;  %v397_v44 = vld [vmem:[%s833_s12 + $0x50] sm:$0xff]  ;;  %v398_v45 = vld [vmem:[%s833_s12 + $0x58] sm:$0xff]  ;;  %v377_v61 = vrot.slane %v372_v31, %v362_v48 }
  0x21   : > { %689 = vmatprep.subr.bf16.mxu0 %v688_v17  ;;  %v371_v40 = vsub.f32 %v357_v29, %v367_v33  ;;  %v698_v41 = vpack.c.bf16 %v396_v37, %v395_v36  ;;  %v415_v46 = vld [vmem:[%s833_s12 + $0xe0] sm:$0xff]  ;;  %v416_v47 = vld [vmem:[%s833_s12 + $0xe8] sm:$0xff]  ;;  %v702_v49 = vpack.c.bf16 %v398_v45, %v397_v44  ;;  %v417_v53 = vld [vmem:[%s833_s12 + $0xf0] sm:$0xff] }
  0x22   : > { %v704_v50 = vpack.c.bf16 %v416_v47, %v415_v46  ;;  %v399_v51 = vld [vmem:[%s833_s12 + $0x60] sm:$0xff]  ;;  %v400_v52 = vld [vmem:[%s833_s12 + $0x68] sm:$0xff]  ;;  %v418_v54 = vld [vmem:[%s833_s12 + $0xf8] sm:$0xff] }
  0x23   : > { %v385_v42 = vmul.f32 %v381_v34, %v371_v40  ;;  %v706_v56 = vpack.c.bf16 %v400_v52, %v399_v51  ;;  %v356_v57 = vld [vmem:[%s824_s30] sm:$0xff]  ;;  %v708_v58 = vpack.c.bf16 %v418_v54, %v417_v53  ;;  %v401_v59 = vld [vmem:[%s833_s12 + $0x70] sm:$0xff]  ;;  %v402_v60 = vld [vmem:[%s833_s12 + $0x78] sm:$0xff] }
  0x24   : > { %691 = vmatpush3.bf16.msra.mxu0 %v690_v22  ;;  %v370_v62 = vsub.f32 %v356_v57, %v363_v55  ;;  %v710_v63 = vpack.c.bf16 %v402_v60, %v401_v59  ;;  %v386_v2 = vld [vmem:[#allocation2] sm:$0xff] }
  0x25   : > { %693 = vmatprep.subr.bf16.mxu0 %v692_v24  ;;  %483 = vmatprep.mubr.f32.mxu0 %v385_v42  ;;  %v641_v7 = vld [vmem:[%s900_s4] ss:$0 sm:$0xff] (!%p640_p7) }
  0x26   : > { %v384_v0 = vmul.f32 %v377_v61, %v370_v62 }
  0x28   : > { %695 = vmatpush3.bf16.msra.mxu0 %v694_v32 }
  0x29   : > { %697 = vmatprep.subr.bf16.mxu0 %v696_v35 }
  0x2c   : > { %699 = vmatpush3.bf16.msra.mxu0 %v698_v41 }
  0x2d   : > { %701 = vmatprep.subr.bf16.mxu0 %v700_v43 }
  0x30   : > { %703 = vmatpush3.bf16.msra.mxu0 %v702_v49 }
  0x31   : > { %705 = vmatprep.subr.bf16.mxu0 %v704_v50 }
  0x34   : > { %707 = vmatpush3.bf16.msra.mxu0 %v706_v56 }
  0x35   : > { %709 = vmatprep.subr.bf16.mxu0 %v708_v58 }
  0x38   : > { %711 = vmatpush3.bf16.msra.mxu0 %v710_v63 }
  0x3b   : > { %484 = vmatmul.mubr.f32.vlgmr.msra.gmra.mrb[0].mxu0 %v384_v0 }
 0x10e   : > { %v677_v1 = vpop.f32.mrb[0].mxu0  ;;  %494 = sbr.rel (%p640_p7) target bundleno = 287 (0x11f), region = 48 }
 0x10f   : > { %v678_v3 = vpop.f32.mrb[1].mxu0 }
 0x110   : > { %v679_v4 = vadd.f32 %v678_v3, %v677_v1 }
 0x112   : > { %v489_v5 = vadd.f32 %v679_v4, %v386_v2 }
 0x114   : > { %490 = vst [vmem:[#allocation2] sm:$0xff] %v489_v5 }
 0x11b   : > { %v495_v6 = vld [vmem:[#allocation2] sm:$0xff] }
 0x11c   : > { %v503_v8 = vadd.f32 %v641_v7, %v495_v6 }
 0x11e   : > { %504 = vst [vmem:[%s901_s5] sm:$0xff] %v503_v8 }
 0x11f PF: > { %s15_s20 = sadd.s32 1, %s759_s20   ;;  %s902_s18 = smov %s755_s19 }
 0x120   : > { %p12_p8 = scmp.ge.s32.totalorder %s15_s20, 5   ;;  %s903_s19 = smov %s905_s21 }
 0x122   :  { %14 = sbr.rel (!%p12_p8) target bundleno = 2 (0x2), region = 90 }

</bundles_post_ra>
